<compile_context>
chip_gen: v7x
topology: tpu7x:2x2x1
jax: 0.10.0
libtpu: 0.0.40
codegen_flags: <defaults>
</compile_context>

<pallas_src>
import functools

import jax
import jax.numpy as jnp
from jax.experimental import pallas as pl
from jax.experimental.pallas import tpu as pltpu


def _label_attention_kernel(x_ref, w1_ref, w2_ref, w3_ref, b3_ref, out_ref,
                            h_ref, *, bb, t, t_pad, c_chunk):
    """One (batch-block, C-tile) grid step.

    x_ref  : [bb*t_pad, D]     (compute dtype)
    w1_ref : [D, P_pad]        (compute dtype, resident, single-buffered)
    w2_ref : [P_pad, C_tile]   (compute dtype)
    w3_ref : [D, C_tile]       (compute dtype)
    b3_ref : [1, C_tile]       (f32)
    out_ref: [bb, C_tile]      (f32)
    h_ref  : [bb*t_pad, P_pad] VMEM scratch, persists across the C axis.
    """
    x = x_ref[...]

    # h = tanh(x @ W1^T): computed once per batch block (first C tile),
    # reused for every other C tile of the same batch block.
    @pl.when(pl.program_id(1) == 0)
    def _():
        h_new = jnp.tanh(jnp.dot(x, w1_ref[...],
                                 preferred_element_type=jnp.float32))
        h_ref[...] = h_new.astype(h_ref.dtype)

    h = h_ref[...]
    ct = out_ref.shape[-1]

    # Static sequence-padding mask: padded token rows (zero x, no bias in the
    # first two linears -> logits == 0, exp == 1) must not pollute the softmax.
    if t_pad != t:
        row = jax.lax.broadcasted_iota(jnp.int32, (1, t_pad, 1), 1)
        seq_mask = (row < t).astype(jnp.float32)
    else:
        seq_mask = None

    # Process the C tile in chunks so chunk k+1's MXU matmuls can overlap
    # chunk k's VPU/EUP softmax tail.
    for j in range(ct // c_chunk):
        cs = pl.ds(j * c_chunk, c_chunk)                       # static slice
        logits = jnp.dot(h, w2_ref[:, cs], preferred_element_type=jnp.float32)
        xw3 = jnp.dot(x, w3_ref[:, cs], preferred_element_type=jnp.float32)
        logits = logits.reshape(bb, t_pad, c_chunk)
        xw3 = xw3.reshape(bb, t_pad, c_chunk)

        # Softmax over the sequence axis (PyTorch dim=1), fused with the
        # weighted reduction: out = sum_t(e * xW3) / sum_t(e) + b3.
        e = jnp.exp(logits - jnp.max(logits, axis=1, keepdims=True))
        if seq_mask is not None:
            e = e * seq_mask
        num = jnp.sum(e * xw3, axis=1)                          # [bb, c_chunk]
        den = jnp.sum(e, axis=1)                                # [bb, c_chunk]
        res = num * pl.reciprocal(den, approx=True) + b3_ref[:, cs]
        out_ref[:, cs] = res.astype(out_ref.dtype)


def _round_up(v, m):
    return ((v + m - 1) // m) * m


def _pick_block_b(B, t_pad, D, p_pad, c_tile, itemsize, budget_bytes):
    """Batch block: fits the VMEM budget, minimizes zero-padding, and gives
    >= 2 batch blocks when B > 8 (so both v7x TensorCores get work)."""
    per_seq = (2 * t_pad * D * itemsize        # x block (double-buffered)
               + t_pad * p_pad * itemsize      # h scratch
               + 3 * t_pad * c_tile * 4        # f32 logits / e / xw3 temporaries
               + 2 * c_tile * 4)               # out block (double-buffered)
    fixed = (D * p_pad * itemsize              # w1 (single-buffered)
             + 2 * (p_pad + D) * c_tile * itemsize   # w2 + w3 (double-buffered)
             + 2 * c_tile * 4)                 # b3
    avail = max(budget_bytes - fixed, per_seq)
    cap = max(8, min(32, (avail // per_seq) // 8 * 8))
    if B > 8:
        cap = min(cap, _round_up(pl.cdiv(B, 2), 8))
    best_bb, best_key = 8, None
    for bb in range(8, int(cap) + 1, 8):
        waste = pl.cdiv(B, bb) * bb - B
        key = (waste, pl.cdiv(B, bb))          # minimal padding, then fewer steps
        if best_key is None or key < best_key:
            best_key, best_bb = key, bb
    return int(best_bb)


def label_attention(x, w1_t, w2_t, w3_t, b3, *, block_b=None, c_tile=1024,
                    compute_dtype=jnp.bfloat16,
                    vmem_budget_bytes=32 * 1024 * 1024,
                    vmem_limit_bytes=None):
    """LAAT forward.  x:[B,T,D], w1_t:[D,P], w2_t:[P,C], w3_t:[D,C], b3:[C].

    Matmul operands are cast to `compute_dtype` (bf16 by default on every TPU
    generation; the MXU is native bf16 and all accumulation + the softmax stay
    f32).  Pass compute_dtype=jnp.float32 for an all-f32 path.
    Returns float32 [B, C].
    """
    B, T, D = x.shape
    P = w1_t.shape[1]
    C = w2_t.shape[1]

    cdt = jnp.dtype(compute_dtype)
    itemsize = cdt.itemsize

    # ---- static padding: sublane-align T, MXU-align P, lane-align / tile C --
    t_pad = _round_up(T, 8)
    p_pad = _round_up(max(P, 128), 128)        # use 256 on v6e/v7x for full MXU
    c_lane = _round_up(C, 128)
    ct = max(128, (min(c_tile, c_lane) // 128) * 128)    # C tile (mult. of 128)
    c_pad = pl.cdiv(C, ct) * ct

    # ---- batch blocking ------------------------------------------------------
    if block_b is None:
        block_b = _pick_block_b(B, t_pad, D, p_pad, ct, itemsize,
                                vmem_budget_bytes)
    block_b = max(8, _round_up(int(block_b), 8))
    b_pad = pl.cdiv(B, block_b) * block_b

    # In-kernel C chunking (MXU / VPU interleave).
    c_chunk = 256 if (ct > 256 and ct % 256 == 0) else ct

    # ---- operand preparation (wrapper side, padded columns/rows are zero) ----
    xp = x.astype(cdt)
    if b_pad != B or t_pad != T:
        xp = jnp.pad(xp, ((0, b_pad - B), (0, t_pad - T), (0, 0)))
    x2d = xp.reshape(b_pad * t_pad, D)

    w1p = jnp.zeros((D, p_pad), cdt).at[:, :P].set(w1_t.astype(cdt))
    w2p = jnp.zeros((p_pad, c_pad), cdt).at[:P, :C].set(w2_t.astype(cdt))
    w3p = jnp.zeros((D, c_pad), cdt).at[:, :C].set(w3_t.astype(cdt))
    b3p = jnp.zeros((1, c_pad), jnp.float32).at[0, :C].set(b3.astype(jnp.float32))

    # ---- VMEM sizing / compiler hints ----------------------------------------
    est = (2 * block_b * t_pad * D * itemsize
           + D * p_pad * itemsize
           + 2 * (p_pad + D) * ct * itemsize
           + 2 * ct * 4
           + 2 * block_b * ct * 4
           + block_b * t_pad * p_pad * itemsize
           + 3 * block_b * t_pad * min(ct, 2 * c_chunk) * 4)
    if vmem_limit_bytes is None:
        vmem_limit_bytes = min(96 * 1024 * 1024,
                               max(32 * 1024 * 1024, int(est * 3 // 2) + (4 << 20)))

    cost = pl.CostEstimate(
        flops=int(2 * b_pad * t_pad * (D * p_pad + (p_pad + D) * c_pad)),
        transcendentals=int(b_pad * t_pad * (p_pad + c_pad)),
        bytes_accessed=int(x2d.size * itemsize + w1p.size * itemsize
                           + w2p.size * itemsize + w3p.size * itemsize
                           + b3p.size * 4 + b_pad * c_pad * 4),
    )

    kernel = functools.partial(_label_attention_kernel, bb=block_b, t=T,
                               t_pad=t_pad, c_chunk=c_chunk)

    out = pl.pallas_call(
        kernel,
        out_shape=jax.ShapeDtypeStruct((b_pad, c_pad), jnp.float32),
        grid_spec=pltpu.PrefetchScalarGridSpec(
            num_scalar_prefetch=0,
            grid=(b_pad // block_b, c_pad // ct),     # (batch blocks, C tiles)
            in_specs=[
                # x: index map independent of c -> DMA'd once per batch block.
                pl.BlockSpec((block_b * t_pad, D), lambda b, c: (b, 0)),
                # W1: fully resident; constant index map -> single buffer.
                pl.BlockSpec((D, p_pad), lambda b, c: (0, 0),
                             pipeline_mode=pl.Buffered(1)),
                # W2 / W3 / b3: tiled over the C grid axis (double-buffered).
                pl.BlockSpec((p_pad, ct), lambda b, c: (0, c)),
                pl.BlockSpec((D, ct), lambda b, c: (0, c)),
                pl.BlockSpec((1, ct), lambda b, c: (0, c)),
            ],
            out_specs=pl.BlockSpec((block_b, ct), lambda b, c: (b, c)),
            scratch_shapes=[pltpu.VMEM((block_b * t_pad, p_pad), cdt)],
        ),
        compiler_params=pltpu.CompilerParams(
            dimension_semantics=("parallel", "arbitrary"),
            vmem_limit_bytes=int(vmem_limit_bytes),
        ),
        cost_estimate=cost,
    )(x2d, w1p, w2p, w3p, b3p)

    return out[:B, :C]


def label_attention_ref(x, w1_t, w2_t, w3_t, b3):
    """Plain-JAX reference reproducing the PyTorch forward exactly."""
    h = jnp.tanh(jnp.einsum("btd,dp->btp", x, w1_t))
    logits = jnp.einsum("btp,pc->btc", h, w2_t)
    att = jax.nn.softmax(logits, axis=1)              # softmax over seq (dim=1)
    att = jnp.swapaxes(att, 1, 2)                     # [B, C, T]
    weighted = jnp.einsum("bct,btd->bcd", att, x)     # [B, C, D]
    w3 = w3_t.T                                       # [C, D]
    return jnp.sum(w3[None, :, :] * weighted, axis=2) + b3[None, :]


if __name__ == "__main__":
    def run_case(B, T, D, P, C, seed=0):
        key = jax.random.PRNGKey(seed)
        kx, k1, k2, k3, kb = jax.random.split(key, 5)
        x = jax.random.normal(kx, (B, T, D), dtype=jnp.float32)
        # Parameter init matching the module (normal, mean=0, std=0.03).
        w1 = 0.03 * jax.random.normal(k1, (P, D), dtype=jnp.float32)
        w2 = 0.03 * jax.random.normal(k2, (C, P), dtype=jnp.float32)
        w3 = 0.03 * jax.random.normal(k3, (C, D), dtype=jnp.float32)
        b3 = 0.03 * jax.random.normal(kb, (C,), dtype=jnp.float32)

        ref = label_attention_ref(x, w1.T, w2.T, w3.T, b3)

        # All-f32 path (tolerance relaxed slightly for the approx EUP recip).
        out_f32 = jax.block_until_ready(
            label_attention(x, w1.T, w2.T, w3.T, b3, compute_dtype=jnp.float32))
        assert out_f32.shape == (B, C)
        assert jnp.allclose(out_f32, ref, atol=2e-3, rtol=2e-3), (out_f32, ref)

        # Default bf16 matmul-operand path (f32 accumulation + f32 softmax).
        out_bf16 = jax.block_until_ready(
            label_attention(x, w1.T, w2.T, w3.T, b3))
        assert out_bf16.shape == (B, C)
        assert jnp.allclose(out_bf16, ref, atol=2e-2, rtol=2e-2), (out_bf16, ref)

    # Module-consistent small shapes: batch=2, seq=8, input=32, proj=16, classes=4.
    run_case(2, 8, 32, 16, 4, seed=0)
    # Non-multiple-of-8 sequence length exercises the masked-pad softmax path.
    run_case(3, 7, 32, 16, 4, seed=1)

    print("KERNEL_OK")
</pallas_src>

<mosaic_0001>
module attributes {stable_mosaic.version = 11 : i64} {
  func.func @_label_attention_kernel(%arg0: i32, %arg1: i32, %arg2: memref<64x32xf32, #tpu.memory_space<vmem>>, %arg3: memref<32x128xf32, #tpu.memory_space<vmem>>, %arg4: memref<128x128xf32, #tpu.memory_space<vmem>>, %arg5: memref<32x128xf32, #tpu.memory_space<vmem>>, %arg6: memref<1x128xf32, #tpu.memory_space<vmem>>, %arg7: memref<8x128xf32, #tpu.memory_space<vmem>>, %arg8: memref<64x128xf32, #tpu.memory_space<vmem>>) attributes {dimension_semantics = [#tpu.dimension_semantics<parallel>, #tpu.dimension_semantics<arbitrary>], iteration_bounds = array<i64: 1, 1>, scalar_prefetch = 0 : i64, scratch_operands = 1 : i64, tpu.core_type = #tpu.core_type<tc>, window_params = [{transform_indices = @transform_0, window_bounds = array<i64: 64, 32>}, {pipeline_mode = #tpu.pipeline_mode<synchronous>, transform_indices = @transform_1, window_bounds = array<i64: 32, 128>}, {transform_indices = @transform_2, window_bounds = array<i64: 128, 128>}, {transform_indices = @transform_3, window_bounds = array<i64: 32, 128>}, {transform_indices = @transform_4, window_bounds = array<i64: 1, 128>}, {transform_indices = @transform_5, window_bounds = array<i64: 8, 128>}]} {
    %c0 = arith.constant 0 : index
    %c0_0 = arith.constant 0 : index
    %0 = vector.load %arg2[%c0, %c0_0] : memref<64x32xf32, #tpu.memory_space<vmem>>, vector<64x32xf32>
    %c0_i32 = arith.constant 0 : i32
    %1 = arith.cmpi eq, %arg1, %c0_i32 : i32
    %2 = arith.extui %1 : i1 to i32
    %c0_i32_1 = arith.constant 0 : i32
    %3 = arith.cmpi ne, %2, %c0_i32_1 : i32
    scf.if %3 {
      %c0_16 = arith.constant 0 : index
      %c0_17 = arith.constant 0 : index
      %25 = vector.load %arg3[%c0_16, %c0_17] : memref<32x128xf32, #tpu.memory_space<vmem>>, vector<32x128xf32>
      %cst_18 = arith.constant dense<0.000000e+00> : vector<64x128xf32>
      %26 = tpu.matmul %0, %25, %cst_18 {dimension_numbers = #tpu.dot_dimension_numbers<[1], [0], [0], [1], [0, 0, 1, 1], [], []>} : vector<64x32xf32>, vector<32x128xf32>, vector<64x128xf32> -> vector<64x128xf32>
      %27 = math.tanh %26 : vector<64x128xf32>
      %c0_19 = arith.constant 0 : index
      %c0_20 = arith.constant 0 : index
      %28 = vector.load %arg8[%c0_19, %c0_20] : memref<64x128xf32, #tpu.memory_space<vmem>>, vector<64x128xf32>
      tpu.vector_store %arg8[%c0_19, %c0_20], %27 {strides = array<i32>} : memref<64x128xf32, #tpu.memory_space<vmem>>, vector<64x128xf32>,
    } else {
    }
    %c0_2 = arith.constant 0 : index
    %c0_3 = arith.constant 0 : index
    %4 = vector.load %arg8[%c0_2, %c0_3] : memref<64x128xf32, #tpu.memory_space<vmem>>, vector<64x128xf32>
    %c0_4 = arith.constant 0 : index
    %c0_5 = arith.constant 0 : index
    %5 = vector.load %arg4[%c0_4, %c0_5] : memref<128x128xf32, #tpu.memory_space<vmem>>, vector<128x128xf32>
    %cst = arith.constant dense<0.000000e+00> : vector<64x128xf32>
    %6 = tpu.matmul %4, %5, %cst {dimension_numbers = #tpu.dot_dimension_numbers<[1], [0], [0], [1], [0, 0, 1, 1], [], []>} : vector<64x128xf32>, vector<128x128xf32>, vector<64x128xf32> -> vector<64x128xf32>
    %c0_6 = arith.constant 0 : index
    %c0_7 = arith.constant 0 : index
    %7 = vector.load %arg5[%c0_6, %c0_7] : memref<32x128xf32, #tpu.memory_space<vmem>>, vector<32x128xf32>
    %cst_8 = arith.constant dense<0.000000e+00> : vector<64x128xf32>
    %8 = tpu.matmul %0, %7, %cst_8 {dimension_numbers = #tpu.dot_dimension_numbers<[1], [0], [0], [1], [0, 0, 1, 1], [], []>} : vector<64x32xf32>, vector<32x128xf32>, vector<64x128xf32> -> vector<64x128xf32>
    %9 = vector.shape_cast %6 : vector<64x128xf32> to vector<8x8x128xf32>
    %10 = vector.shape_cast %8 : vector<64x128xf32> to vector<8x8x128xf32>
    %cst_9 = arith.constant dense<0xFF800000> : vector<8x128xf32>
    %11 = vector.multi_reduction <maximumf>, %9, %cst_9 [1] : vector<8x8x128xf32> to vector<8x128xf32>
    %12 = vector.shape_cast %11 : vector<8x128xf32> to vector<8x1x128xf32>
    %13 = vector.broadcast %12 : vector<8x1x128xf32> to vector<8x8x128xf32>
    %14 = arith.subf %9, %13 : vector<8x8x128xf32>
    %15 = math.exp %14 : vector<8x8x128xf32>
    %16 = arith.mulf %15, %10 : vector<8x8x128xf32>
    %cst_10 = arith.constant dense<0.000000e+00> : vector<8x128xf32>
    %17 = vector.multi_reduction <add>, %16, %cst_10 [1] : vector<8x8x128xf32> to vector<8x128xf32>
    %cst_11 = arith.constant dense<0.000000e+00> : vector<8x128xf32>
    %18 = vector.multi_reduction <add>, %15, %cst_11 [1] : vector<8x8x128xf32> to vector<8x128xf32>
    %19 = tpu.reciprocal %18 {approx = true} : vector<8x128xf32> -> vector<8x128xf32>
    %20 = arith.mulf %17, %19 : vector<8x128xf32>
    %c0_12 = arith.constant 0 : index
    %c0_13 = arith.constant 0 : index
    %21 = vector.load %arg6[%c0_12, %c0_13] : memref<1x128xf32, #tpu.memory_space<vmem>>, vector<1x128xf32>
    %22 = vector.broadcast %21 : vector<1x128xf32> to vector<8x128xf32>
    %23 = arith.addf %20, %22 : vector<8x128xf32>
    %c0_14 = arith.constant 0 : index
    %c0_15 = arith.constant 0 : index
    %24 = vector.load %arg7[%c0_14, %c0_15] : memref<8x128xf32, #tpu.memory_space<vmem>>, vector<8x128xf32>
    tpu.vector_store %arg7[%c0_14, %c0_15], %23 {strides = array<i32>} : memref<8x128xf32, #tpu.memory_space<vmem>>, vector<8x128xf32>,
    return
  }
  func.func @transform_0(%arg0: i32, %arg1: i32) -> (i32, i32) {
    %c0_i32 = arith.constant 0 : i32
    %c0_i32_0 = arith.constant 0 : i32
    return %arg0, %c0_i32 : i32, i32
  }
  func.func @transform_1(%arg0: i32, %arg1: i32) -> (i32, i32) {
    %c0_i32 = arith.constant 0 : i32
    %c0_i32_0 = arith.constant 0 : i32
    %c0_i32_1 = arith.constant 0 : i32
    return %c0_i32, %c0_i32_0 : i32, i32
  }
  func.func @transform_2(%arg0: i32, %arg1: i32) -> (i32, i32) {
    %c0_i32 = arith.constant 0 : i32
    %c0_i32_0 = arith.constant 0 : i32
    return %c0_i32, %arg1 : i32, i32
  }
  func.func @transform_3(%arg0: i32, %arg1: i32) -> (i32, i32) {
    %c0_i32 = arith.constant 0 : i32
    %c0_i32_0 = arith.constant 0 : i32
    return %c0_i32, %arg1 : i32, i32
  }
  func.func @transform_4(%arg0: i32, %arg1: i32) -> (i32, i32) {
    %c0_i32 = arith.constant 0 : i32
    %c0_i32_0 = arith.constant 0 : i32
    return %c0_i32, %arg1 : i32, i32
  }
  func.func @transform_5(%arg0: i32, %arg1: i32) -> (i32, i32) {
    %c0_i32 = arith.constant 0 : i32
    return %arg0, %arg1 : i32, i32
  }
}

</mosaic_0001>

<bundles_post_ra>
// kernel: tpu_custom_call.1
= control target key start
LH: loop header
LB: loop body
LE: loop exit
PB: predicated region body
PF: predicated region fallthrough
CT: control target
= control target key end

     0   :  { %10 = vsyncpa [#allocation4], 0  ;;  %s1170_s0 = inlined_call_operand.vmem [shape: f32[64,32], index: 0, kind: input, shape index: {}]   ;;  %s1171_s1 = inlined_call_operand.vmem [shape: f32[32,128], index: 1, kind: input, shape index: {}]   ;;  %s1172_s2 = inlined_call_operand.hbm [shape: f32[128,128], index: 2, kind: input, shape index: {}]   ;;  %s1173_s3 = inlined_call_operand.vmem [shape: f32[32,128], index: 3, kind: input, shape index: {}]   ;;  %s1174_s4 = inlined_call_operand.vmem [shape: f32[1,128], index: 4, kind: input, shape index: {}]   ;;  %s1175_s5 = inlined_call_operand.hbm [shape: f32[8,128], index: 5, kind: output, shape index: {}]  }
   0x1   :  { %11 = vsyncpa [#allocation5], 0  ;;  %s1010_s18 = smov [#allocation3]   ;;  %s962_s22 = scalar_lea.hbm %s1172_s2, 2048 }
   0x2   :  { %s21_s19 = sshll.u32 %s1010_s18, 4  ;;  %p963_p0 = scmp.ne.s32.totalorder %s1172_s2, %s962_s22  ;;  %s22_s19 = int_to_ptr.vmem [resolvable:$true] %s21_s19 }
   0x3   :  { %p966_p1 = scmp.lt.u32.totalorder %s962_s22, %s1172_s2 }
   0x5   :  { %p968_p2 = pnand %p966_p1, %p963_p0 }
   0x7   :  { %971 = shalt.err (!%p968_p2)
}
   0x8   :  { %s972_s27 = scalar_lea.vmem %s22_s19, 2048  ;;  %p977_p4 = scmp.lt.s32.totalorder %s22_s19, %s22_s19 }
   0x9   :  { %p973_p3 = scmp.ne.s32.totalorder %s22_s19, %s972_s27  ;;  %p978_p5 = scmp.lt.s32.totalorder %s972_s27, %s972_s27 }
   0xb   :  { %p979_p6 = por %p978_p5, %p977_p4 }
   0xd   :  { %p980_p7 = pnand %p979_p6, %p973_p3 }
   0xf   :  { %983 = shalt.err (!%p980_p7)
}
  0x10   :  { %s1011_s28 = smov 128   ;;  %s1012_s29 = smov 8  }
  0x11   :  { %27 = dma.hbm_to_vmem [thread:$0]  %s1172_s2, 2048, %s22_s19, [#allocation4], %s1011_s28, %s1011_s28, %s1012_s29  }
  0x12   :  { %1006 = dma.done.wait [#allocation4], 2048  }
  0x13   :  { %1007 = vsyncadd [#allocation4], 4294965248  ;;  %vm51_vm0 = vcmask 261120   ;;  %v47_v0 = vld [vmem:[%s1171_s1] sm:$0xff]  ;;  %v48_v1 = vld [vmem:[%s1171_s1 + $0x8] sm:$0xff]  ;;  %vm676_vm1 = vcmask 1041409  }
  0x14   :  { %v49_v2 = vld [vmem:[%s1171_s1 + $0x10] sm:$0xff]  ;;  %v862_v3 = vpack.c.bf16 %v48_v1, %v47_v0  ;;  %v50_v4 = vld [vmem:[%s1171_s1 + $0x18] sm:$0xff]  ;;  %v35_v5 = vld [vmem:[%s1170_s0] sm:$0xff]  ;;  %vm679_vm2 = vcmask 1042434   ;;  %vm682_vm3 = vcmask 1043459   ;;  %vm685_vm4 = vcmask 1044484  }
  0x15   :  { %v866_v6 = vpack.c.bf16 %v50_v4, %v49_v2  ;;  %786 = vmatprep.mubr.msk.f32.mxu0 %vm51_vm0, %v35_v5  ;;  %v205_v7 = vld [vmem:[#allocation3] sm:$0xff]  ;;  %v206_v8 = vld [vmem:[#allocation3 + $0x8] sm:$0xff]  ;;  %v207_v9 = vld [vmem:[#allocation3 + $0x10] sm:$0xff]  ;;  %vm688_vm5 = vcmask 1045509   ;;  %vm691_vm6 = vcmask 1046534   ;;  %vm694_vm7 = vcmask 1047559  }
  0x16   :  { %863 = vmatprep.subr.bf16.mxu0 %v862_v3  ;;  %v870_v10 = vpack.c.bf16 %v206_v8, %v205_v7  ;;  %v208_v11 = vld [vmem:[#allocation3 + $0x18] sm:$0xff]  ;;  %v209_v13 = vld [vmem:[#allocation3 + $0x20] sm:$0xff]  ;;  %v210_v14 = vld [vmem:[#allocation3 + $0x28] sm:$0xff] }
  0x17   :  { %865 = vmatpush3.bf16.msra.mxu0 %v862_v3  ;;  %v874_v12 = vpack.c.bf16 %v208_v11, %v207_v9  ;;  %v36_v15 = vld [vmem:[%s1170_s0 + $0x8] sm:$0xff]  ;;  %v37_v16 = vld [vmem:[%s1170_s0 + $0x10] sm:$0xff]  ;;  %v878_v17 = vpack.c.bf16 %v210_v14, %v209_v13  ;;  %v212_v19 = vld [vmem:[#allocation3 + $0x38] sm:$0xff] }
  0x18   :  { %867 = vmatprep.subr.bf16.mxu0 %v866_v6  ;;  %871 = vmatprep.subr.bf16.mxu1 %v870_v10  ;;  %v211_v18 = vld [vmem:[#allocation3 + $0x30] sm:$0xff]  ;;  %v38_v20 = vld [vmem:[%s1170_s0 + $0x18] sm:$0xff]  ;;  %v39_v21 = vld [vmem:[%s1170_s0 + $0x20] sm:$0xff] }
  0x19   :  { %873 = vmatpush3.bf16.msra.mxu1 %v870_v10  ;;  %v882_v22 = vpack.c.bf16 %v212_v19, %v211_v18  ;;  %v213_v23 = vld [vmem:[#allocation3 + $0x40] sm:$0xff]  ;;  %v214_v24 = vld [vmem:[#allocation3 + $0x48] sm:$0xff]  ;;  %v41_v26 = vld [vmem:[%s1170_s0 + $0x30] sm:$0xff] }
  0x1a   :  { %875 = vmatprep.subr.bf16.mxu1 %v874_v12  ;;  %v40_v25 = vld [vmem:[%s1170_s0 + $0x28] sm:$0xff]  ;;  %v886_v27 = vpack.c.bf16 %v214_v24, %v213_v23  ;;  %v42_v28 = vld [vmem:[%s1170_s0 + $0x38] sm:$0xff]  ;;  %v215_v29 = vld [vmem:[#allocation3 + $0x50] sm:$0xff] }
  0x1b   :  { %869 = vmatpush3.bf16.msra.mxu0 %v866_v6  ;;  %v216_v30 = vld [vmem:[#allocation3 + $0x58] sm:$0xff]  ;;  %v217_v32 = vld [vmem:[#allocation3 + $0x60] sm:$0xff]  ;;  %v218_v33 = vld [vmem:[#allocation3 + $0x68] sm:$0xff] }
  0x1c   :  { %v890_v31 = vpack.c.bf16 %v216_v30, %v215_v29  ;;  %v894_v34 = vpack.c.bf16 %v218_v33, %v217_v32  ;;  %v219_v35 = vld [vmem:[#allocation3 + $0x70] sm:$0xff]  ;;  %v220_v36 = vld [vmem:[#allocation3 + $0x78] sm:$0xff]  ;;  %v326_v38 = vld [vmem:[%s1173_s3] sm:$0xff] }
  0x1d   :  { %877 = vmatpush3.bf16.msra.mxu1 %v874_v12  ;;  %v898_v37 = vpack.c.bf16 %v220_v36, %v219_v35  ;;  %v327_v39 = vld [vmem:[%s1173_s3 + $0x8] sm:$0xff]  ;;  %v328_v40 = vld [vmem:[%s1173_s3 + $0x10] sm:$0xff]  ;;  %v329_v42 = vld [vmem:[%s1173_s3 + $0x18] sm:$0xff] }
  0x1e   :  { %787 = vmatmul.mubr.msk.f32.vlgmr.msra.gmra.mrb[0].mxu0 %vm51_vm0, %v36_v15  ;;  %879 = vmatprep.subr.bf16.mxu1 %v878_v17  ;;  %v902_v41 = vpack.c.bf16 %v327_v39, %v326_v38  ;;  %v906_v43 = vpack.c.bf16 %v329_v42, %v328_v40 }
  0x1f   :  { %789 = vmatprep.mubr.msk.f32.mxu0 %vm51_vm0, %v37_v16 }
  0x20   :  { %903 = vmatprep.subr.bf16.mxu0 %v902_v41 }
  0x21   :  { %881 = vmatpush3.bf16.msra.mxu1 %v878_v17  ;;  %905 = vmatpush3.bf16.msra.mxu0 %v902_v41 }
  0x22   :  { %790 = vmatmul.mubr.msk.f32.gmra.mrb[2].mxu0 %vm51_vm0, %v38_v20  ;;  %883 = vmatprep.subr.bf16.mxu1 %v882_v22 }
  0x23   :  { %792 = vmatprep.mubr.msk.f32.mxu0 %vm51_vm0, %v39_v21  ;;  %907 = vmatprep.subr.bf16.mxu0 %v906_v43 }
  0x25   :  { %885 = vmatpush3.bf16.msra.mxu1 %v882_v22  ;;  %909 = vmatpush3.bf16.msra.mxu0 %v906_v43 }
  0x26   :  { %793 = vmatmul.mubr.msk.f32.gmra.mrb[4].mxu0 %vm51_vm0, %v40_v25  ;;  %887 = vmatprep.subr.bf16.mxu1 %v886_v27 }
  0x27   :  { %795 = vmatprep.mubr.msk.f32.mxu0 %vm51_vm0, %v41_v26 }
  0x29   :  { %889 = vmatpush3.bf16.msra.mxu1 %v886_v27 }
  0x2a   :  { %796 = vmatmul.mubr.msk.f32.gmra.mrb[6].mxu0 %vm51_vm0, %v42_v28  ;;  %891 = vmatprep.subr.bf16.mxu1 %v890_v31 }
  0x2b   :  { %850 = vmatprep.mubr.msk.f32.mxu0 %vm51_vm0, %v35_v5 }
  0x2d   :  { %893 = vmatpush3.bf16.msra.mxu1 %v890_v31 }
  0x2e   :  { %895 = vmatprep.subr.bf16.mxu1 %v894_v34  ;;  %851 = vmatmul.mubr.msk.f32.vlgmr.msra.gmra.mrb[8].mxu0 %vm51_vm0, %v36_v15 }
  0x2f   :  { %853 = vmatprep.mubr.msk.f32.mxu0 %vm51_vm0, %v37_v16 }
  0x31   :  { %897 = vmatpush3.bf16.msra.mxu1 %v894_v34 }
  0x32   :  { %899 = vmatprep.subr.bf16.mxu1 %v898_v37  ;;  %854 = vmatmul.mubr.msk.f32.gmra.mrb[10].mxu0 %vm51_vm0, %v38_v20 }
  0x33   :  { %856 = vmatprep.mubr.msk.f32.mxu0 %vm51_vm0, %v39_v21 }
  0x35   :  { %901 = vmatpush3.bf16.msra.mxu1 %v898_v37 }
  0x36   :  { %857 = vmatmul.mubr.msk.f32.gmra.mrb[12].mxu0 %vm51_vm0, %v40_v25 }
  0x37   :  { %859 = vmatprep.mubr.msk.f32.mxu0 %vm51_vm0, %v41_v26 }
  0x3a   :  { %860 = vmatmul.mubr.msk.f32.gmra.mrb[14].mxu0 %vm51_vm0, %v42_v28 }
  0xf1   :  { %v788_v44 = vpop.f32.mrb[0].mxu0 }
  0xf2   :  { %v142_v45 = vpop.f32.mrb[1].mxu0 }
  0xf3   :  { %914 = vtanh.f32 %v142_v45 }
  0xf4   :  { %916 = vtanh.f32 %v788_v44 }
  0xf5   :  { %v791_v46 = vpop.f32.mrb[2].mxu0 }
  0xf6   :  { %v152_v47 = vpop.f32.mrb[3].mxu0 }
  0xf7   :  { %918 = vtanh.f32 %v152_v47 }
  0xf8   :  { %920 = vtanh.f32 %v791_v46 }
  0xf9   :  { %v794_v48 = vpop.f32.mrb[4].mxu0 }
  0xfa   :  { %v162_v49 = vpop.f32.mrb[5].mxu0 }
  0xfb   :  { %922 = vtanh.f32 %v162_v49 }
  0xfc   :  { %924 = vtanh.f32 %v794_v48 }
  0xfd   :  { %v915_v50 = vpop.eup %914  ;;  %v797_v51 = vpop.f32.mrb[6].mxu0 }
  0xfe   :  { %v917_v52 = vpop.eup %916  ;;  %v172_v53 = vpop.f32.mrb[7].mxu0  ;;  %830 = vmatprep.mubr.f32.mxu1 %v915_v50 }
  0xff   :  { %926 = vtanh.f32 %v172_v53  ;;  %831 = vmatmul.mubr.f32.vlgmr.msra.gmra.mrb[0].mxu1 %v917_v52 }
 0x100   :  { %928 = vtanh.f32 %v797_v51 }
 0x101   :  { %v919_v54 = vpop.eup %918  ;;  %v1120_v60 = vpop.f32.mrb[8].mxu0 }
 0x102   :  { %v921_v55 = vpop.eup %920  ;;  %833 = vmatprep.mubr.f32.mxu1 %v919_v54  ;;  %v1122_v61 = vpop.f32.mrb[9].mxu0 }
 0x103   :  { %834 = vmatmul.mubr.f32.gmra.mrb[2].mxu1 %v921_v55 }
 0x105   :  { %v923_v56 = vpop.eup %922  ;;  %v1124_v62 = vpop.f32.mrb[10].mxu0 }
 0x106   :  { %v925_v57 = vpop.eup %924  ;;  %836 = vmatprep.mubr.f32.mxu1 %v923_v56  ;;  %v1126_v63 = vpop.f32.mrb[11].mxu0 }
 0x107   :  { %837 = vmatmul.mubr.f32.gmra.mrb[4].mxu1 %v925_v57 }
 0x109   :  { %v927_v58 = vpop.eup %926  ;;  %v1128_v0 = vpop.f32.mrb[12].mxu0 }
 0x10a   :  { %v929_v59 = vpop.eup %928  ;;  %839 = vmatprep.mubr.f32.mxu1 %v927_v58  ;;  %v1130_v1 = vpop.f32.mrb[13].mxu0 }
 0x10b   :  { %840 = vmatmul.mubr.f32.gmra.mrb[6].mxu1 %v929_v59 }
 0x10d   :  { %v1132_v2 = vpop.f32.mrb[14].mxu0 }
 0x10e   :  { %v1134_v3 = vpop.f32.mrb[15].mxu0 }
 0x1d2   :  { %v832_v4 = vpop.f32.mrb[0].mxu1 }
 0x1d3   :  { %v466_v5 = vrot.slane %v832_v4, 4  ;;  %v287_v6 = vpop.f32.mrb[1].mxu1 }
 0x1d4   :  { %v460_v7 = vrot.slane %v287_v6, 4 }
 0x1d5   :  { %v467_v8 = vmax.f32 %v832_v4, %v466_v5 }
 0x1d6   :  { %v461_v9 = vmax.f32 %v287_v6, %v460_v7  ;;  %v835_v10 = vpop.f32.mrb[2].mxu1 }
 0x1d7   :  { %v468_v11 = vrot.slane %v467_v8, 2  ;;  %v478_v12 = vrot.slane %v835_v10, 4  ;;  %v297_v13 = vpop.f32.mrb[3].mxu1 }
 0x1d8   :  { %v462_v14 = vrot.slane %v461_v9, 2  ;;  %v472_v15 = vrot.slane %v297_v13, 4 }
 0x1d9   :  { %v469_v16 = vmax.f32 %v467_v8, %v468_v11  ;;  %v479_v17 = vmax.f32 %v835_v10, %v478_v12 }
 0x1da   :  { %v463_v18 = vmax.f32 %v461_v9, %v462_v14  ;;  %v473_v19 = vmax.f32 %v297_v13, %v472_v15  ;;  %v838_v20 = vpop.f32.mrb[4].mxu1 }
 0x1db   :  { %v470_v21 = vrot.slane %v469_v16, 1  ;;  %v480_v22 = vrot.slane %v479_v17, 2  ;;  %v490_v23 = vrot.slane %v838_v20, 4  ;;  %v307_v24 = vpop.f32.mrb[5].mxu1 }
 0x1dc   :  { %v464_v25 = vrot.slane %v463_v18, 1  ;;  %v474_v26 = vrot.slane %v473_v19, 2  ;;  %v484_v27 = vrot.slane %v307_v24, 4 }
 0x1dd   :  { %v471_v28 = vmax.f32 %v469_v16, %v470_v21  ;;  %v481_v29 = vmax.f32 %v479_v17, %v480_v22  ;;  %v491_v30 = vmax.f32 %v838_v20, %v490_v23 }
 0x1de   :  { %v465_v31 = vmax.f32 %v463_v18, %v464_v25  ;;  %v475_v32 = vmax.f32 %v473_v19, %v474_v26  ;;  %v485_v33 = vmax.f32 %v307_v24, %v484_v27  ;;  %v841_v34 = vpop.f32.mrb[6].mxu1 }
 0x1df   :  { %v509_v35 = vsub.f32 %v832_v4, %v471_v28  ;;  %v482_v36 = vrot.slane %v481_v29, 1  ;;  %v492_v37 = vrot.slane %v491_v30, 2  ;;  %v502_v38 = vrot.slane %v841_v34, 4  ;;  %v317_v39 = vpop.f32.mrb[7].mxu1 }
 0x1e0   :  { %v508_v40 = vsub.f32 %v287_v6, %v465_v31  ;;  %v476_v41 = vrot.slane %v475_v32, 1  ;;  %v486_v42 = vrot.slane %v485_v33, 2  ;;  %v496_v43 = vrot.slane %v317_v39, 4 }
 0x1e1   :  { %v518_v44 = vmul.f32 1.442695, %v509_v35  ;;  %v483_v45 = vmax.f32 %v481_v29, %v482_v36  ;;  %v493_v46 = vmax.f32 %v491_v30, %v492_v37  ;;  %v503_v47 = vmax.f32 %v841_v34, %v502_v38 }
 0x1e2   :  { %v516_v48 = vmul.f32 1.442695, %v508_v40  ;;  %v477_v49 = vmax.f32 %v475_v32, %v476_v41  ;;  %v487_v50 = vmax.f32 %v485_v33, %v486_v42  ;;  %v497_v51 = vmax.f32 %v317_v39, %v496_v43 }
 0x1e3   :  { %930 = vpow2.f32 %v518_v44  ;;  %v511_v52 = vsub.f32 %v835_v10, %v483_v45  ;;  %v494_v53 = vrot.slane %v493_v46, 1  ;;  %v504_v54 = vrot.slane %v503_v47, 2 }
 0x1e4   :  { %932 = vpow2.f32 %v516_v48  ;;  %v510_v55 = vsub.f32 %v297_v13, %v477_v49  ;;  %v488_v56 = vrot.slane %v487_v50, 1  ;;  %v498_v57 = vrot.slane %v497_v51, 2 }
 0x1e5   :  { %v522_v58 = vmul.f32 1.442695, %v511_v52  ;;  %v495_v59 = vmax.f32 %v493_v46, %v494_v53  ;;  %v505_v4 = vmax.f32 %v503_v47, %v504_v54 }
 0x1e6   :  { %v520_v5 = vmul.f32 1.442695, %v510_v55  ;;  %v489_v6 = vmax.f32 %v487_v50, %v488_v56  ;;  %v499_v7 = vmax.f32 %v497_v51, %v498_v57 }
 0x1e7   :  { %934 = vpow2.f32 %v522_v58  ;;  %v513_v8 = vsub.f32 %v838_v20, %v495_v59  ;;  %v506_v9 = vrot.slane %v505_v4, 1 }
 0x1e8   :  { %936 = vpow2.f32 %v520_v5  ;;  %v512_v11 = vsub.f32 %v307_v24, %v489_v6  ;;  %v500_v12 = vrot.slane %v499_v7, 1 }
 0x1e9   :  { %v507_v14 = vmax.f32 %v505_v4, %v506_v9  ;;  %v526_v15 = vmul.f32 1.442695, %v513_v8 }
 0x1ea   :  { %v501_v10 = vmax.f32 %v499_v7, %v500_v12  ;;  %v524_v17 = vmul.f32 1.442695, %v512_v11 }
 0x1eb   :  { %v515_v16 = vsub.f32 %v841_v34, %v507_v14  ;;  %938 = vpow2.f32 %v526_v15 }
 0x1ec   :  { %v514_v13 = vsub.f32 %v317_v39, %v501_v10  ;;  %940 = vpow2.f32 %v524_v17 }
 0x1ed   :  { %v931_v18 = vpop.eup %930  ;;  %v530_v19 = vmul.f32 1.442695, %v515_v16 }
 0x1ee   :  { %v933_v21 = vpop.eup %932  ;;  %v533_v22 = vmul.f32 %v931_v18, %v1120_v60  ;;  %v594_v23 = vrot.slane %v931_v18, 4  ;;  %v528_v26 = vmul.f32 1.442695, %v514_v13 }
 0x1ef   :  { %v532_v25 = vmul.f32 %v933_v21, %v1122_v61  ;;  %v588_v20 = vrot.slane %v933_v21, 4  ;;  %942 = vpow2.f32 %v530_v19 }
 0x1f0   :  { %v546_v24 = vrot.slane %v533_v22, 4  ;;  %v595_v27 = vadd.f32 %v931_v18, %v594_v23  ;;  %944 = vpow2.f32 %v528_v26 }
 0x1f1   :  { %v935_v28 = vpop.eup %934  ;;  %v540_v29 = vrot.slane %v532_v25, 4  ;;  %v589_v30 = vadd.f32 %v933_v21, %v588_v20 }
 0x1f2   :  { %v937_v31 = vpop.eup %936  ;;  %v547_v32 = vadd.f32 %v546_v24, %v533_v22  ;;  %v596_v33 = vrot.slane %v595_v27, 2  ;;  %v535_v34 = vmul.f32 %v935_v28, %v1124_v62  ;;  %v606_v35 = vrot.slane %v935_v28, 4 }
 0x1f3   :  { %v541_v60 = vadd.f32 %v540_v29, %v532_v25  ;;  %v590_v36 = vrot.slane %v589_v30, 2  ;;  %v534_v37 = vmul.f32 %v937_v31, %v1126_v63  ;;  %v600_v61 = vrot.slane %v937_v31, 4 }
 0x1f4   :  { %v597_v38 = vadd.f32 %v596_v33, %v595_v27  ;;  %v558_v39 = vrot.slane %v535_v34, 4  ;;  %v607_v40 = vadd.f32 %v935_v28, %v606_v35  ;;  %v548_v44 = vrot.slane %v547_v32, 2  ;;  %v1147_v35 = vld [vmem:[%s1174_s4] ss:$0 sm:$0xff]  ;;  %s1013_s4 = smov [#allocation6]  }
 0x1f5   :  { %v591_v41 = vadd.f32 %v590_v36, %v589_v30  ;;  %v552_v42 = vrot.slane %v534_v37, 4  ;;  %v601_v43 = vadd.f32 %v937_v31, %v600_v61  ;;  %v542_v48 = vrot.slane %v541_v60, 2  ;;  %v939_v53 = vpop.eup %938  ;;  %s704_s12 = sshll.u32 %s1013_s4, 4  ;;  %s705_s12 = int_to_ptr.vmem [resolvable:$true] %s704_s12 }
 0x1f6   :  { %v598_v45 = vrot.slane %v597_v38, 1  ;;  %v559_v46 = vadd.f32 %v558_v39, %v535_v34  ;;  %v608_v47 = vrot.slane %v607_v40, 2  ;;  %v941_v56 = vpop.eup %940  ;;  %v549_v57 = vadd.f32 %v548_v44, %v547_v32  ;;  %s984_s13 = scalar_lea.vmem %s705_s12, 128  ;;  %p989_p9 = scmp.lt.s32.totalorder %s705_s12, %s705_s12 }
 0x1f7   :  { %v592_v49 = vrot.slane %v591_v41, 1  ;;  %v602_v62 = vrot.slane %v601_v43, 2  ;;  %v553_v52 = vadd.f32 %v552_v42, %v534_v37  ;;  %v543_v4 = vadd.f32 %v542_v48, %v541_v60  ;;  %p985_p8 = scmp.ne.s32.totalorder %s705_s12, %s984_s13  ;;  %p990_p10 = scmp.lt.s32.totalorder %s984_s13, %s984_s13 }
 0x1f8   :  { %v599_v50 = vadd.f32 %v598_v45, %v597_v38  ;;  %v609_v51 = vadd.f32 %v608_v47, %v607_v40  ;;  %v560_v54 = vrot.slane %v559_v46, 2  ;;  %v537_v8 = vmul.f32 %v939_v53, %v1128_v0 }
 0x1f9   :  { %v593_v63 = vadd.f32 %v592_v49, %v591_v41  ;;  %v603_v55 = vadd.f32 %v602_v62, %v601_v43  ;;  %v943_v59 = vpop.eup %942  ;;  %v554_v7 = vrot.slane %v553_v52, 2  ;;  %v618_v9 = vrot.slane %v939_v53, 4  ;;  %p991_p11 = por %p990_p10, %p989_p9 }
 0x1fa   :  { %946 = vrcp.f32 %v599_v50  ;;  %v610_v58 = vrot.slane %v609_v51, 1  ;;  %v561_v11 = vadd.f32 %v560_v54, %v559_v46  ;;  %v536_v14 = vmul.f32 %v941_v56, %v1130_v1  ;;  %v945_v15 = vpop.eup %944 }
 0x1fb   :  { %948 = vrcp.f32 %v593_v63  ;;  %v604_v5 = vrot.slane %v603_v55, 1  ;;  %v612_v10 = vrot.slane %v941_v56, 4  ;;  %v550_v16 = vrot.slane %v549_v57, 1  ;;  %p992_p12 = pnand %p991_p11, %p985_p8 }
 0x1fc   :  { %v611_v6 = vadd.f32 %v610_v58, %v609_v51  ;;  %v570_v17 = vrot.slane %v537_v8, 4  ;;  %v619_v13 = vadd.f32 %v939_v53, %v618_v9  ;;  %v544_v18 = vrot.slane %v543_v4, 1 }
 0x1fd   :  { %v605_v12 = vadd.f32 %v604_v5, %v603_v55  ;;  %v564_v19 = vrot.slane %v536_v14, 4  ;;  %v613_v21 = vadd.f32 %v941_v56, %v612_v10  ;;  %v555_v22 = vadd.f32 %v554_v7, %v553_v52 }
 0x1fe   :  { %950 = vrcp.f32 %v611_v6  ;;  %v620_v23 = vrot.slane %v619_v13, 2  ;;  %v539_v25 = vmul.f32 %v943_v59, %v1132_v2  ;;  %v630_v0 = vrot.slane %v943_v59, 4 }
 0x1ff   :  { %952 = vrcp.f32 %v605_v12  ;;  %v562_v20 = vrot.slane %v561_v11, 1  ;;  %v571_v26 = vadd.f32 %v570_v17, %v537_v8  ;;  %v614_v24 = vrot.slane %v613_v21, 2 }
 0x200   :  { %v538_v1 = vmul.f32 %v945_v15, %v1134_v3  ;;  %v621_v27 = vadd.f32 %v620_v23, %v619_v13  ;;  %v565_v28 = vadd.f32 %v564_v19, %v536_v14  ;;  %v631_v29 = vadd.f32 %v943_v59, %v630_v0 }
 0x201   :  { %v624_v30 = vrot.slane %v945_v15, 4  ;;  %v551_v31 = vadd.f32 %v550_v16, %v549_v57  ;;  %v615_v32 = vadd.f32 %v614_v24, %v613_v21  ;;  %v582_v33 = vrot.slane %v539_v25, 4 }
 0x202   :  { %v545_v2 = vadd.f32 %v544_v18, %v543_v4  ;;  %v556_v60 = vrot.slane %v555_v22, 1  ;;  %v622_v36 = vrot.slane %v621_v27, 1  ;;  %v632_v37 = vrot.slane %v631_v29, 2 }
 0x203   :  { %v563_v38 = vadd.f32 %v562_v20, %v561_v11  ;;  %v572_v39 = vrot.slane %v571_v26, 2  ;;  %v616_v40 = vrot.slane %v615_v32, 1  ;;  %v566_v43 = vrot.slane %v565_v28, 2 }
 0x204   :  { %v947_v34 = vpop.eup %946  ;;  %v623_v42 = vadd.f32 %v622_v36, %v621_v27  ;;  %v625_v44 = vadd.f32 %v945_v15, %v624_v30  ;;  %v583_v47 = vadd.f32 %v582_v33, %v539_v25  ;;  %v633_v48 = vadd.f32 %v632_v37, %v631_v29 }
 0x205   :  { %v949_v61 = vpop.eup %948  ;;  %v645_v3 = vmul.f32 %v947_v34, %v551_v31  ;;  %v617_v46 = vadd.f32 %v616_v40, %v615_v32  ;;  %v557_v50 = vadd.f32 %v556_v60, %v555_v22  ;;  %v576_v51 = vrot.slane %v538_v1, 4 }
 0x206   :  { %v644_v41 = vmul.f32 %v949_v61, %v545_v2  ;;  %954 = vrcp.f32 %v623_v42  ;;  %v573_v54 = vadd.f32 %v572_v39, %v571_v26  ;;  %v567_v56 = vadd.f32 %v566_v43, %v565_v28 }
 0x207   :  { %v660_v45 = vadd.f32 %v1147_v35, %v645_v3  ;;  %956 = vrcp.f32 %v617_v46  ;;  %v634_v57 = vrot.slane %v633_v48, 1  ;;  %v584_v4 = vrot.slane %v583_v47, 2 }
 0x208   :  { %v951_v49 = vpop.eup %950  ;;  %v659_v62 = vadd.f32 %v1147_v35, %v644_v41  ;;  %v626_v5 = vrot.slane %v625_v44, 2  ;;  %v577_v8 = vadd.f32 %v576_v51, %v538_v1  ;;  %v574_v9 = vrot.slane %v573_v54, 1 }
 0x209   :  { %v953_v52 = vpop.eup %952  ;;  %v675_v53 = vrot.slane %v660_v45, 7  ;;  %v647_v63 = vmul.f32 %v951_v49, %v563_v38  ;;  %v635_v7 = vadd.f32 %v634_v57, %v633_v48  ;;  %v568_v14 = vrot.slane %v567_v56, 1 }
 0x20a   :  { %v646_v55 = vmul.f32 %v953_v52, %v557_v50  ;;  %v627_v11 = vadd.f32 %v626_v5, %v625_v44  ;;  %v585_v15 = vadd.f32 %v584_v4, %v583_v47  ;;  %v578_v17 = vrot.slane %v577_v8, 2 }
 0x20b   :  { %v677_v58 = vsel %vm676_vm1, %v675_v53, %v659_v62  ;;  %v662_v59 = vadd.f32 %v1147_v35, %v647_v63  ;;  %958 = vrcp.f32 %v635_v7  ;;  %v575_v18 = vadd.f32 %v574_v9, %v573_v54 }
 0x20c   :  { %v661_v6 = vadd.f32 %v1147_v35, %v646_v55  ;;  %v628_v16 = vrot.slane %v627_v11, 1  ;;  %v569_v23 = vadd.f32 %v568_v14, %v567_v56  ;;  %v586_v20 = vrot.slane %v585_v15, 1 }
 0x20d   :  { %v681_v10 = vrot.slane %v662_v59, 5  ;;  %v579_v24 = vadd.f32 %v578_v17, %v577_v8 }
 0x20e   :  { %v678_v12 = vrot.slane %v661_v6, 6  ;;  %v629_v19 = vadd.f32 %v628_v16, %v627_v11  ;;  %v587_v28 = vadd.f32 %v586_v20, %v585_v15 }
 0x20f   :  { %v580_v31 = vrot.slane %v579_v24, 1 }
 0x210   :  { %v680_v13 = vsel %vm679_vm2, %v678_v12, %v677_v58  ;;  %v955_v22 = vpop.eup %954  ;;  %960 = vrcp.f32 %v629_v19 }
 0x211   :  { %v683_v21 = vsel %vm682_vm3, %v681_v10, %v680_v13  ;;  %v957_v25 = vpop.eup %956  ;;  %v649_v0 = vmul.f32 %v955_v22, %v575_v18  ;;  %v581_v60 = vadd.f32 %v580_v31, %v579_v24 }
 0x212   :  { %v648_v26 = vmul.f32 %v957_v25, %v569_v23 }
 0x213   :  { %v664_v1 = vadd.f32 %v1147_v35, %v649_v0 }
 0x214   :  { %v663_v27 = vadd.f32 %v1147_v35, %v648_v26 }
 0x215   :  { %v959_v29 = vpop.eup %958  ;;  %v687_v32 = vrot.slane %v664_v1, 3 }
 0x216   :  { %v684_v30 = vrot.slane %v663_v27, 4  ;;  %v651_v33 = vmul.f32 %v959_v29, %v587_v28 }
 0x218   :  { %v686_v34 = vsel %vm685_vm4, %v684_v30, %v683_v21  ;;  %v666_v61 = vadd.f32 %v1147_v35, %v651_v33 }
 0x219   :  { %v689_v2 = vsel %vm688_vm5, %v687_v32, %v686_v34 }
 0x21a   :  { %v961_v36 = vpop.eup %960  ;;  %v693_v39 = vrot.slane %v666_v61, 1 }
 0x21b   :  { %v650_v37 = vmul.f32 %v961_v36, %v581_v60 }
 0x21d   :  { %v665_v3 = vadd.f32 %v1147_v35, %v650_v37 }
 0x21f   :  { %v690_v38 = vrot.slane %v665_v3, 2 }
 0x221   :  { %v692_v40 = vsel %vm691_vm6, %v690_v38, %v689_v2 }
 0x222   :  { %v695_v41 = vsel %vm694_vm7, %v693_v39, %v692_v40 }
 0x223   :  { %697 = vst [vmem:[#allocation6] sm:$0xff] %v695_v41 }
 0x224   :  { %995 = shalt.err (!%p992_p12)
}
 0x225   :  { %s996_s15 = scalar_lea.hbm %s1175_s5, 128 }
 0x226   :  { %p997_p13 = scmp.ne.s32.totalorder %s1175_s5, %s996_s15  ;;  %p1000_p0 = scmp.lt.u32.totalorder %s996_s15, %s1175_s5 }
 0x228   :  { %p1002_p1 = pnand %p1000_p0, %p997_p13 }
 0x22a   :  { %1005 = shalt.err (!%p1002_p1)
}
 0x22b   :  { %707 = dma.vmem_to_hbm [thread:$0]  %s705_s12, 128, %s1175_s5, [#allocation5]  }
 0x22c   :  { %1008 = dma.done.wait [#allocation5], 128  }
 0x22d   :  { %1009 = vsyncadd [#allocation5], 4294967168 }
 0x22e   :  { %711 = vsyncpa [#allocation4], 1 }
 0x22f   :  { %712 = vsyncpa [#allocation5], 1 }

</bundles_post_ra>
